<compile_context>
chip_gen: v7x
topology: tpu7x:2x2x1
jax: 0.10.0
libtpu: 0.0.40
codegen_flags: <defaults>
</compile_context>

<pallas_src>
import jax
import jax.numpy as jnp
from jax.experimental import pallas as pl
from jax.experimental.pallas import tpu as pltpu


def _round_up(x, m):
    return ((x + m - 1) // m) * m


def _fused_mlp_kernel(x_ref, w1_ref, b1_ref, w2_ref, b2_ref, o_ref, acc_ref):
    k = pl.program_id(1)

    @pl.when(k == 0)
    def _init():
        acc_ref[...] = jnp.zeros_like(acc_ref)

    # dense1 slice: h_k = relu(x @ W1[:, k_tile] + b1[k_tile])  (MXU, f32 accumulate;
    # downcast for stage 2 fused into the relu so there is a single cast pass).
    h = jnp.dot(x_ref[...], w1_ref[...], preferred_element_type=jnp.float32)
    h = jnp.maximum(h + b1_ref[...], 0.0).astype(w2_ref.dtype)

    # dense2 partial sum over the hidden tile: acc += h_k @ W2[k_tile, :]
    acc_ref[...] += jnp.dot(h, w2_ref[...], preferred_element_type=jnp.float32)

    @pl.when(k == pl.num_programs(1) - 1)
    def _finalize():
        # Same (stateless) ReLU as dense1 -- mirrors the shared nn.ReLU submodule.
        o_ref[...] = jnp.maximum(acc_ref[...] + b2_ref[...], 0.0).astype(o_ref.dtype)


def shared_submodule_mlp_forward(
    x, w1, b1, w2, b2, *,
    block_rows=256,
    weight_block_budget_bytes=24 << 20,   # per-k-step W1+W2 block budget (fits all gens)
    compute_dtype=None,                   # e.g. jnp.bfloat16 on v6e/v7x
):
    """Fused dense1->relu->dense2->relu forward.

    x : [B, input_size]
    w1: [input_size, hidden_size]   (transposed vs. torch.nn.Linear.weight)
    b1: [hidden_size]
    w2: [hidden_size, output_size]
    b2: [output_size]
    """
    B, d_in = x.shape
    d_hid = w1.shape[1]
    d_out = w2.shape[1]
    out_dtype = x.dtype

    if compute_dtype is not None:
        x = x.astype(compute_dtype)
        w1 = w1.astype(compute_dtype)
        w2 = w2.astype(compute_dtype)
    # Bias add + relu epilogue stays in f32 on every generation.
    b1 = b1.astype(jnp.float32)
    b2 = b2.astype(jnp.float32)

    itemsize = jnp.dtype(x.dtype).itemsize
    out_itemsize = jnp.dtype(out_dtype).itemsize

    # ---- lane-dense output / hidden dims (multiples of 128) ---------------------
    d_out_p = _round_up(d_out, 128)

    # ---- hidden-axis (stage-2 contraction) tiling so weight blocks fit VMEM -----
    per_hid_col_bytes = (d_in + d_out_p) * itemsize          # one W1 column + one W2 row
    d_hid_128 = _round_up(d_hid, 128)
    if d_hid_128 * per_hid_col_bytes <= weight_block_budget_bytes:
        tk = d_hid_128                                        # fully resident fast path
    else:
        # double-buffered per-step blocks must fit the budget
        tk = (weight_block_budget_bytes // (2 * per_hid_col_bytes)) // 128 * 128
        tk = max(128, min(tk, d_hid_128))
    d_hid_p = _round_up(d_hid, tk)                            # guarantees tk | d_hid_p
    n_k = d_hid_p // tk

    # Zero-pad (exact: padded hidden columns give relu(0)=0, contribute nothing).
    if d_hid_p != d_hid:
        w1 = jnp.pad(w1, ((0, 0), (0, d_hid_p - d_hid)))
        b1 = jnp.pad(b1, ((0, d_hid_p - d_hid),))
        w2 = jnp.pad(w2, ((0, d_hid_p - d_hid), (0, 0)))
    if d_out_p != d_out:
        w2 = jnp.pad(w2, ((0, 0), (0, d_out_p - d_out)))
        b2 = jnp.pad(b2, ((0, d_out_p - d_out),))
    b1 = b1.reshape(1, d_hid_p)
    b2 = b2.reshape(1, d_out_p)

    # ---- row tile: try for >= 2 grid steps so both v7x TensorCores get work -----
    if B <= 8:
        tm = B                                   # full extent (always legal)
    else:
        tm = min(block_rows, _round_up(-(-B // 2), 8))
    n_rows = pl.cdiv(B, tm)
    grid = (n_rows, n_k)

    # ---- explicit scoped-VMEM limit from actual block bytes (+headroom) ---------
    buf_w = 1 if n_k == 1 else 2                 # resident weights single-buffered
    vmem_bytes = (
        2 * tm * d_in * itemsize                 # x tile (double buffered)
        + 2 * tm * d_out_p * out_itemsize        # out tile (double buffered)
        + buf_w * (d_in * tk * itemsize + tk * d_out_p * itemsize + tk * 4)  # W1, W2, b1
        + d_out_p * 4                            # b2 (single buffered)
        + tm * d_out_p * 4                       # f32 accumulator scratch
        + tm * tk * 4                            # f32 h intermediate
    )
    vmem_limit = int(vmem_bytes * 1.5) + (4 << 20)
    vmem_limit = max(16 << 20, min(vmem_limit, 64 << 20))     # portable cap (v7x = 64 MiB)

    def _spec(shape, index_map, single_buffer):
        if single_buffer:
            return pl.BlockSpec(shape, index_map, pipeline_mode=pl.Buffered(1))
        return pl.BlockSpec(shape, index_map)

    resident = (n_k == 1)
    in_specs = [
        pl.BlockSpec((tm, d_in), lambda i, k: (i, 0)),                # x rows
        _spec((d_in, tk), lambda i, k: (0, k), resident),             # W1
        _spec((1, tk), lambda i, k: (0, k), resident),                # b1
        _spec((tk, d_out_p), lambda i, k: (k, 0), resident),          # W2
        _spec((1, d_out_p), lambda i, k: (0, 0), True),               # b2 (always resident)
    ]
    out_specs = pl.BlockSpec((tm, d_out_p), lambda i, k: (i, 0))

    flops = 2 * B * (d_in * d_hid_p + d_hid_p * d_out_p)
    bytes_accessed = int(
        (B * d_in + d_in * d_hid_p + d_hid_p + d_hid_p * d_out_p + d_out_p) * itemsize
        + B * d_out_p * out_itemsize
    )

    y_p = pl.pallas_call(
        _fused_mlp_kernel,
        out_shape=jax.ShapeDtypeStruct((B, d_out_p), out_dtype),
        grid_spec=pltpu.PrefetchScalarGridSpec(
            num_scalar_prefetch=0,
            grid=grid,
            in_specs=in_specs,
            out_specs=out_specs,
            scratch_shapes=[pltpu.VMEM((tm, d_out_p), jnp.float32)],
        ),
        compiler_params=pltpu.CompilerParams(
            dimension_semantics=("parallel", "arbitrary"),
            vmem_limit_bytes=vmem_limit,
        ),
        cost_estimate=pl.CostEstimate(
            flops=flops, transcendentals=0, bytes_accessed=bytes_accessed
        ),
    )(x, w1, b1, w2, b2)

    return y_p[:, :d_out] if d_out_p != d_out else y_p


class DummyModelWithSharedSubmodulePallas:
    """Mirror of the PyTorch DummyModelWithSharedSubmodule.

    dense1 and dense2 share one nn.ReLU instance in PyTorch; ReLU is stateless so the
    fused kernel simply applies the same max(., 0) after each linear stage.
    """

    def __init__(self, w1, b1, w2, b2, *, compute_dtype=None):
        self.w1, self.b1, self.w2, self.b2 = w1, b1, w2, b2
        self.compute_dtype = compute_dtype

    def __call__(self, x):
        return shared_submodule_mlp_forward(
            x, self.w1, self.b1, self.w2, self.b2, compute_dtype=self.compute_dtype
        )


if __name__ == "__main__":
    key = jax.random.PRNGKey(0)
    kx, kw1, kb1, kw2, kb2 = jax.random.split(key, 5)

    batch, input_size, hidden_size, output_size = 8, 16, 32, 8

    x = jax.random.normal(kx, (batch, input_size), dtype=jnp.float32)
    # Weights stored (in, out); equivalent to torch Linear.weight.T.
    w1 = jax.random.normal(kw1, (input_size, hidden_size), dtype=jnp.float32) * 0.1
    b1 = jax.random.normal(kb1, (hidden_size,), dtype=jnp.float32) * 0.1
    w2 = jax.random.normal(kw2, (hidden_size, output_size), dtype=jnp.float32) * 0.1
    b2 = jax.random.normal(kb2, (output_size,), dtype=jnp.float32) * 0.1

    model = DummyModelWithSharedSubmodulePallas(w1, b1, w2, b2)
    y = jax.block_until_ready(model(x))

    # Pure-JAX reference of the PyTorch forward.
    h_ref = jnp.maximum(x @ w1 + b1, 0.0)
    y_ref = jnp.maximum(h_ref @ w2 + b2, 0.0)

    assert y.shape == (batch, output_size) and y.dtype == x.dtype
    assert jnp.allclose(y, y_ref, rtol=1e-5, atol=1e-5)

    print("KERNEL_OK")
</pallas_src>

<mosaic_0001>
module attributes {stable_mosaic.version = 11 : i64} {
  func.func @_fused_mlp_kernel(%arg0: i32, %arg1: i32, %arg2: memref<8x16xf32, #tpu.memory_space<vmem>>, %arg3: memref<16x128xf32, #tpu.memory_space<vmem>>, %arg4: memref<1x128xf32, #tpu.memory_space<vmem>>, %arg5: memref<128x128xf32, #tpu.memory_space<vmem>>, %arg6: memref<1x128xf32, #tpu.memory_space<vmem>>, %arg7: memref<8x128xf32, #tpu.memory_space<vmem>>, %arg8: memref<8x128xf32, #tpu.memory_space<vmem>>) attributes {dimension_semantics = [#tpu.dimension_semantics<parallel>, #tpu.dimension_semantics<arbitrary>], iteration_bounds = array<i64: 1, 1>, scalar_prefetch = 0 : i64, scratch_operands = 1 : i64, tpu.core_type = #tpu.core_type<tc>, window_params = [{transform_indices = @transform_0, window_bounds = array<i64: 8, 16>}, {pipeline_mode = #tpu.pipeline_mode<synchronous>, transform_indices = @transform_1, window_bounds = array<i64: 16, 128>}, {pipeline_mode = #tpu.pipeline_mode<synchronous>, transform_indices = @transform_2, window_bounds = array<i64: 1, 128>}, {pipeline_mode = #tpu.pipeline_mode<synchronous>, transform_indices = @transform_3, window_bounds = array<i64: 128, 128>}, {pipeline_mode = #tpu.pipeline_mode<synchronous>, transform_indices = @transform_4, window_bounds = array<i64: 1, 128>}, {transform_indices = @transform_5, window_bounds = array<i64: 8, 128>}]} {
    %c0_i32 = arith.constant 0 : i32
    %0 = arith.cmpi eq, %arg1, %c0_i32 : i32
    %1 = arith.extui %0 : i1 to i32
    %c0_i32_0 = arith.constant 0 : i32
    %2 = arith.cmpi ne, %1, %c0_i32_0 : i32
    scf.if %2 {
      %cst_16 = arith.constant 0.000000e+00 : f32
      %19 = vector.broadcast %cst_16 : f32 to vector<8x128xf32>
      %c0_17 = arith.constant 0 : index
      %c0_18 = arith.constant 0 : index
      %20 = vector.load %arg8[%c0_17, %c0_18] : memref<8x128xf32, #tpu.memory_space<vmem>>, vector<8x128xf32>
      tpu.vector_store %arg8[%c0_17, %c0_18], %19 {strides = array<i32>} : memref<8x128xf32, #tpu.memory_space<vmem>>, vector<8x128xf32>,
    } else {
    }
    %c0 = arith.constant 0 : index
    %c0_1 = arith.constant 0 : index
    %3 = vector.load %arg2[%c0, %c0_1] : memref<8x16xf32, #tpu.memory_space<vmem>>, vector<8x16xf32>
    %c0_2 = arith.constant 0 : index
    %c0_3 = arith.constant 0 : index
    %4 = vector.load %arg3[%c0_2, %c0_3] : memref<16x128xf32, #tpu.memory_space<vmem>>, vector<16x128xf32>
    %cst = arith.constant dense<0.000000e+00> : vector<8x128xf32>
    %5 = tpu.matmul %3, %4, %cst {dimension_numbers = #tpu.dot_dimension_numbers<[1], [0], [0], [1], [0, 0, 1, 1], [], []>} : vector<8x16xf32>, vector<16x128xf32>, vector<8x128xf32> -> vector<8x128xf32>
    %c0_4 = arith.constant 0 : index
    %c0_5 = arith.constant 0 : index
    %6 = vector.load %arg4[%c0_4, %c0_5] : memref<1x128xf32, #tpu.memory_space<vmem>>, vector<1x128xf32>
    %7 = vector.broadcast %6 : vector<1x128xf32> to vector<8x128xf32>
    %8 = arith.addf %5, %7 : vector<8x128xf32>
    %cst_6 = arith.constant 0.000000e+00 : f32
    %9 = vector.broadcast %cst_6 : f32 to vector<8x128xf32>
    %10 = arith.maximumf %8, %9 : vector<8x128xf32>
    %c0_7 = arith.constant 0 : index
    %c0_8 = arith.constant 0 : index
    %11 = vector.load %arg8[%c0_7, %c0_8] : memref<8x128xf32, #tpu.memory_space<vmem>>, vector<8x128xf32>
    %c0_9 = arith.constant 0 : index
    %c0_10 = arith.constant 0 : index
    %12 = vector.load %arg5[%c0_9, %c0_10] : memref<128x128xf32, #tpu.memory_space<vmem>>, vector<128x128xf32>
    %cst_11 = arith.constant dense<0.000000e+00> : vector<8x128xf32>
    %13 = tpu.matmul %10, %12, %cst_11 {dimension_numbers = #tpu.dot_dimension_numbers<[1], [0], [0], [1], [0, 0, 1, 1], [], []>} : vector<8x128xf32>, vector<128x128xf32>, vector<8x128xf32> -> vector<8x128xf32>
    %14 = arith.addf %11, %13 : vector<8x128xf32>
    %c0_12 = arith.constant 0 : index
    %c0_13 = arith.constant 0 : index
    %15 = vector.load %arg8[%c0_12, %c0_13] : memref<8x128xf32, #tpu.memory_space<vmem>>, vector<8x128xf32>
    tpu.vector_store %arg8[%c0_12, %c0_13], %14 {strides = array<i32>} : memref<8x128xf32, #tpu.memory_space<vmem>>, vector<8x128xf32>,
    %c0_i32_14 = arith.constant 0 : i32
    %16 = arith.cmpi eq, %arg1, %c0_i32_14 : i32
    %17 = arith.extui %16 : i1 to i32
    %c0_i32_15 = arith.constant 0 : i32
    %18 = arith.cmpi ne, %17, %c0_i32_15 : i32
    scf.if %18 {
      %c0_16 = arith.constant 0 : index
      %c0_17 = arith.constant 0 : index
      %19 = vector.load %arg8[%c0_16, %c0_17] : memref<8x128xf32, #tpu.memory_space<vmem>>, vector<8x128xf32>
      %c0_18 = arith.constant 0 : index
      %c0_19 = arith.constant 0 : index
      %20 = vector.load %arg6[%c0_18, %c0_19] : memref<1x128xf32, #tpu.memory_space<vmem>>, vector<1x128xf32>
      %21 = vector.broadcast %20 : vector<1x128xf32> to vector<8x128xf32>
      %22 = arith.addf %19, %21 : vector<8x128xf32>
      %cst_20 = arith.constant 0.000000e+00 : f32
      %23 = vector.broadcast %cst_20 : f32 to vector<8x128xf32>
      %24 = arith.maximumf %22, %23 : vector<8x128xf32>
      %c0_21 = arith.constant 0 : index
      %c0_22 = arith.constant 0 : index
      %25 = vector.load %arg7[%c0_21, %c0_22] : memref<8x128xf32, #tpu.memory_space<vmem>>, vector<8x128xf32>
      tpu.vector_store %arg7[%c0_21, %c0_22], %24 {strides = array<i32>} : memref<8x128xf32, #tpu.memory_space<vmem>>, vector<8x128xf32>,
    } else {
    }
    return
  }
  func.func @transform_0(%arg0: i32, %arg1: i32) -> (i32, i32) {
    %c0_i32 = arith.constant 0 : i32
    %c0_i32_0 = arith.constant 0 : i32
    return %arg0, %c0_i32 : i32, i32
  }
  func.func @transform_1(%arg0: i32, %arg1: i32) -> (i32, i32) {
    %c0_i32 = arith.constant 0 : i32
    %c0_i32_0 = arith.constant 0 : i32
    return %c0_i32, %arg1 : i32, i32
  }
  func.func @transform_2(%arg0: i32, %arg1: i32) -> (i32, i32) {
    %c0_i32 = arith.constant 0 : i32
    %c0_i32_0 = arith.constant 0 : i32
    return %c0_i32, %arg1 : i32, i32
  }
  func.func @transform_3(%arg0: i32, %arg1: i32) -> (i32, i32) {
    %c0_i32 = arith.constant 0 : i32
    %c0_i32_0 = arith.constant 0 : i32
    return %arg1, %c0_i32 : i32, i32
  }
  func.func @transform_4(%arg0: i32, %arg1: i32) -> (i32, i32) {
    %c0_i32 = arith.constant 0 : i32
    %c0_i32_0 = arith.constant 0 : i32
    %c0_i32_1 = arith.constant 0 : i32
    return %c0_i32, %c0_i32_0 : i32, i32
  }
  func.func @transform_5(%arg0: i32, %arg1: i32) -> (i32, i32) {
    %c0_i32 = arith.constant 0 : i32
    %c0_i32_0 = arith.constant 0 : i32
    return %arg0, %c0_i32 : i32, i32
  }
}

</mosaic_0001>

<bundles_post_ra>
// kernel: tpu_custom_call.1
= control target key start
LH: loop header
LB: loop body
LE: loop exit
PB: predicated region body
PF: predicated region fallthrough
CT: control target
= control target key end

     0   :  { %10 = vsyncpa [#allocation4], 0  ;;  %s563_s0 = inlined_call_operand.hbm [shape: f32[8,16], index: 0, kind: input, shape index: {}]   ;;  %s564_s1 = inlined_call_operand.hbm [shape: f32[16,128], index: 1, kind: input, shape index: {}]   ;;  %s565_s2 = inlined_call_operand.vmem [shape: f32[1,128], index: 2, kind: input, shape index: {}]   ;;  %s566_s3 = inlined_call_operand.hbm [shape: f32[128,128], index: 3, kind: input, shape index: {}]   ;;  %s567_s4 = inlined_call_operand.vmem [shape: f32[1,128], index: 4, kind: input, shape index: {}]   ;;  %s568_s5 = inlined_call_operand.hbm [shape: f32[8,128], index: 5, kind: output, shape index: {}]  }
   0x1   :  { %11 = vsyncpa [#allocation7], 0 }
   0x2   :  { %12 = vsyncpa [#allocation5], 0  ;;  %s464_s18 = smov [#allocation6]   ;;  %s370_s22 = scalar_lea.hbm %s564_s1, 256 }
   0x3   :  { %s28_s19 = sshll.u32 %s464_s18, 4  ;;  %p371_p0 = scmp.ne.s32.totalorder %s564_s1, %s370_s22  ;;  %s29_s19 = int_to_ptr.vmem [resolvable:$true] %s28_s19 }
   0x4   :  { %p374_p1 = scmp.lt.u32.totalorder %s370_s22, %s564_s1 }
   0x6   :  { %p376_p2 = pnand %p374_p1, %p371_p0 }
   0x8   :  { %379 = shalt.err (!%p376_p2)
}
   0x9   :  { %s380_s27 = scalar_lea.vmem %s29_s19, 256  ;;  %p385_p4 = scmp.lt.s32.totalorder %s29_s19, %s29_s19 }
   0xa   :  { %p381_p3 = scmp.ne.s32.totalorder %s29_s19, %s380_s27  ;;  %p386_p5 = scmp.lt.s32.totalorder %s380_s27, %s380_s27 }
   0xc   :  { %p387_p6 = por %p386_p5, %p385_p4 }
   0xe   :  { %p388_p7 = pnand %p387_p6, %p381_p3 }
  0x10   :  { %391 = shalt.err (!%p388_p7)
}
  0x11   :  { %s465_s28 = smov 128   ;;  %s466_s29 = smov 8  }
  0x12   :  { %34 = dma.hbm_to_vmem [thread:$0]  %s564_s1, 256, %s29_s19, [#allocation7], %s465_s28, %s465_s28, %s466_s29  }
  0x13   :  { %s467_s7 = smov [#allocation3]   ;;  %s468_s9 = smov [#allocation8]  }
  0x14   :  { %s19_s8 = sshll.u32 %s467_s7, 4  ;;  %s42_s10 = sshll.u32 %s468_s9, 4  ;;  %s20_s8 = int_to_ptr.vmem [resolvable:$true] %s19_s8  ;;  %s43_s10 = int_to_ptr.vmem [resolvable:$true] %s42_s10 }
  0x15   :  { %s392_s13 = scalar_lea.hbm %s563_s0, 128 }
  0x16   :  { %p393_p8 = scmp.ne.s32.totalorder %s563_s0, %s392_s13  ;;  %p396_p9 = scmp.lt.u32.totalorder %s392_s13, %s563_s0 }
  0x18   :  { %p398_p10 = pnand %p396_p9, %p393_p8 }
  0x1a   :  { %401 = shalt.err (!%p398_p10)
}
  0x1b   :  { %s402_s1 = scalar_lea.vmem %s20_s8, 128  ;;  %p407_p12 = scmp.lt.s32.totalorder %s20_s8, %s20_s8 }
  0x1c   :  { %p403_p11 = scmp.ne.s32.totalorder %s20_s8, %s402_s1  ;;  %p408_p13 = scmp.lt.s32.totalorder %s402_s1, %s402_s1 }
  0x1e   :  { %p409_p0 = por %p408_p13, %p407_p12 }
  0x20   :  { %p410_p1 = pnand %p409_p0, %p403_p11 }
  0x22   :  { %413 = shalt.err (!%p410_p1)
}
  0x23   :  { %22 = dma.hbm_to_vmem [thread:$0]  %s563_s0, 128, %s20_s8, [#allocation4]  }
  0x24   :  { %s414_s22 = scalar_lea.hbm %s566_s3, 2048 }
  0x25   :  { %p415_p2 = scmp.ne.s32.totalorder %s566_s3, %s414_s22  ;;  %p418_p3 = scmp.lt.u32.totalorder %s414_s22, %s566_s3 }
  0x27   :  { %p420_p4 = pnand %p418_p3, %p415_p2 }
  0x29   :  { %423 = shalt.err (!%p420_p4)
}
  0x2a   :  { %s424_s27 = scalar_lea.vmem %s43_s10, 2048  ;;  %p429_p6 = scmp.lt.s32.totalorder %s43_s10, %s43_s10 }
  0x2b   :  { %p425_p5 = scmp.ne.s32.totalorder %s43_s10, %s424_s27  ;;  %p430_p7 = scmp.lt.s32.totalorder %s424_s27, %s424_s27 }
  0x2d   :  { %p431_p8 = por %p430_p7, %p429_p6 }
  0x2f   :  { %p432_p9 = pnand %p431_p8, %p425_p5 }
  0x31   :  { %435 = shalt.err (!%p432_p9)
}
  0x32   :  { %48 = dma.hbm_to_vmem [thread:$0]  %s566_s3, 2048, %s43_s10, [#allocation7], %s465_s28, %s465_s28, %s466_s29  }
  0x33   :  { %458 = dma.done.wait [#allocation4], 128  }
  0x34   :  { %459 = vsyncadd [#allocation4], 4294967168 }
  0x35   :  { %460 = dma.done.wait [#allocation7], 2304  }
  0x36   :  { %461 = vsyncadd [#allocation7], 4294964992  ;;  %v469_v0 = vmov 0.0|0.0   ;;  %vm470_vm0 = vmmov 0   ;;  %v471_v1 = vmov 0.0   ;;  %v66_v2 = vld [vmem:[#allocation6] sm:$0xff] }
  0x37   :  { %334 = vmatprep.subr.bf16.mxu0 %v469_v0  ;;  %296 = vmatprep.mubr.msk.f32.mxu0 %vm470_vm0, %v471_v1  ;;  %v67_v3 = vld [vmem:[#allocation6 + $0x8] sm:$0xff]  ;;  %v151_v5 = vld [vmem:[#allocation8] sm:$0xff]  ;;  %v152_v6 = vld [vmem:[#allocation8 + $0x8] sm:$0xff]  ;;  %vm75_vm1 = vcmask 130048   ;;  %s472_s7 = smov [#allocation9]  }
  0x38   :  { %337 = vmatprep.subr.bf16.mxu1 %v469_v0  ;;  %331 = vmatprep.mubr.msk.f32.mxu1 %vm470_vm0, %v471_v1  ;;  %v335_v4 = vpack.c.bf16 %v67_v3, %v66_v2  ;;  %v153_v7 = vld [vmem:[#allocation8 + $0x10] sm:$0xff]  ;;  %v338_v8 = vpack.c.bf16 %v152_v6, %v151_v5  ;;  %v154_v9 = vld [vmem:[#allocation8 + $0x18] sm:$0xff]  ;;  %v65_v10 = vld [vmem:[#allocation3] sm:$0xff]  ;;  %s259_s8 = sshll.u32 %s472_s7, 4  ;;  %s260_s8 = int_to_ptr.vmem [resolvable:$true] %s259_s8 }
  0x39   :  { %v341_v11 = vpack.c.bf16 %v154_v9, %v153_v7  ;;  %v155_v12 = vld [vmem:[#allocation8 + $0x20] sm:$0xff]  ;;  %v156_v13 = vld [vmem:[#allocation8 + $0x28] sm:$0xff]  ;;  %v157_v15 = vld [vmem:[#allocation8 + $0x30] sm:$0xff]  ;;  %s436_s9 = scalar_lea.vmem %s260_s8, 128  ;;  %p441_p11 = scmp.lt.s32.totalorder %s260_s8, %s260_s8 }
  0x3a   :  { %336 = vmatpush3.bf16.msra.mxu0 %v335_v4  ;;  %339 = vmatpush3.bf16.msra.mxu1 %v338_v8  ;;  %v344_v14 = vpack.c.bf16 %v156_v13, %v155_v12  ;;  %v158_v16 = vld [vmem:[#allocation8 + $0x38] sm:$0xff]  ;;  %v159_v18 = vld [vmem:[#allocation8 + $0x40] sm:$0xff]  ;;  %v160_v19 = vld [vmem:[#allocation8 + $0x48] sm:$0xff]  ;;  %p437_p10 = scmp.ne.s32.totalorder %s260_s8, %s436_s9  ;;  %p442_p12 = scmp.lt.s32.totalorder %s436_s9, %s436_s9 }
  0x3b   :  { %340 = vmatprep.subr.bf16.mxu1 %v469_v0  ;;  %v347_v17 = vpack.c.bf16 %v158_v16, %v157_v15  ;;  %v350_v20 = vpack.c.bf16 %v160_v19, %v159_v18  ;;  %v161_v21 = vld [vmem:[#allocation8 + $0x50] sm:$0xff]  ;;  %v162_v22 = vld [vmem:[#allocation8 + $0x58] sm:$0xff]  ;;  %v163_v24 = vld [vmem:[#allocation8 + $0x60] sm:$0xff] }
  0x3c   :  { %v353_v23 = vpack.c.bf16 %v162_v22, %v161_v21  ;;  %v164_v25 = vld [vmem:[#allocation8 + $0x68] sm:$0xff]  ;;  %v165_v27 = vld [vmem:[#allocation8 + $0x70] sm:$0xff]  ;;  %v166_v28 = vld [vmem:[#allocation8 + $0x78] sm:$0xff]  ;;  %p443_p13 = por %p442_p12, %p441_p11 }
  0x3d   :  { %297 = vmatmul.mubr.msk.f32.vlgmr.msra.gmra.mrb[0].mxu0 %vm75_vm1, %v65_v10  ;;  %v356_v26 = vpack.c.bf16 %v164_v25, %v163_v24  ;;  %v359_v29 = vpack.c.bf16 %v166_v28, %v165_v27  ;;  %v269_v30 = vld [vmem:[%s565_s2] ss:$0 sm:$0xff] }
  0x3e   :  { %342 = vmatpush3.bf16.msra.mxu1 %v341_v11  ;;  %v271_v35 = vld [vmem:[%s567_s4] ss:$0 sm:$0xff]  ;;  %p444_p0 = pnand %p443_p13, %p437_p10 }
  0x3f   :  { %343 = vmatprep.subr.bf16.mxu1 %v469_v0 }
  0x42   :  { %345 = vmatpush3.bf16.msra.mxu1 %v344_v14 }
  0x43   :  { %346 = vmatprep.subr.bf16.mxu1 %v469_v0 }
  0x46   :  { %348 = vmatpush3.bf16.msra.mxu1 %v347_v17 }
  0x47   :  { %349 = vmatprep.subr.bf16.mxu1 %v469_v0 }
  0x4a   :  { %351 = vmatpush3.bf16.msra.mxu1 %v350_v20 }
  0x4b   :  { %352 = vmatprep.subr.bf16.mxu1 %v469_v0 }
  0x4e   :  { %354 = vmatpush3.bf16.msra.mxu1 %v353_v23 }
  0x4f   :  { %355 = vmatprep.subr.bf16.mxu1 %v469_v0 }
  0x52   :  { %357 = vmatpush3.bf16.msra.mxu1 %v356_v26 }
  0x53   :  { %358 = vmatprep.subr.bf16.mxu1 %v469_v0 }
  0x56   :  { %360 = vmatpush3.bf16.msra.mxu1 %v359_v29 }
 0x110   :  { %v145_v31 = vpop.f32.mrb[0].mxu0 }
 0x111   :  { %v146_v32 = vadd.f32 %v269_v30, %v145_v31  ;;  %v298_v33 = vpop.f32.mrb[1].mxu0 }
 0x113   :  { %v149_v34 = vmax.f32 %v146_v32, 0.0 }
 0x115   :  { %332 = vmatmul.mubr.f32.vlgmr.msra.gmra.mrb[0].mxu1 %v149_v34 }
 0x1e8   :  { %v233_v36 = vpop.f32.mrb[0].mxu1 }
 0x1e9   :  { %v250_v37 = vadd.f32 %v271_v35, %v233_v36  ;;  %v333_v38 = vpop.f32.mrb[1].mxu1 }
 0x1eb   :  { %v251_v39 = vmax.f32 %v250_v37, 0.0 }
 0x1ed   :  { %252 = vst [vmem:[#allocation9] sm:$0xff] %v251_v39 }
 0x1ee   :  { %447 = shalt.err (!%p444_p0)
}
 0x1ef   :  { %s448_s11 = scalar_lea.hbm %s568_s5, 128 }
 0x1f0   :  { %p449_p1 = scmp.ne.s32.totalorder %s568_s5, %s448_s11  ;;  %p452_p2 = scmp.lt.u32.totalorder %s448_s11, %s568_s5 }
 0x1f2   :  { %p454_p3 = pnand %p452_p2, %p449_p1 }
 0x1f4   :  { %457 = shalt.err (!%p454_p3)
}
 0x1f5   :  { %262 = dma.vmem_to_hbm [thread:$0]  %s260_s8, 128, %s568_s5, [#allocation5]  }
 0x1f6   :  { %462 = dma.done.wait [#allocation5], 128  }
 0x1f7   :  { %463 = vsyncadd [#allocation5], 4294967168 }
 0x1f8   :  { %266 = vsyncpa [#allocation4], 1 }
 0x1f9   :  { %267 = vsyncpa [#allocation7], 1 }
 0x1fa   :  { %268 = vsyncpa [#allocation5], 1 }

</bundles_post_ra>
